<compile_context>
chip_gen: v5e
topology: v5e:2x2
jax: 0.10.0
libtpu: 0.0.40
codegen_flags: <defaults>
</compile_context>

<pallas_src>
import functools

import numpy as np

import jax
import jax.numpy as jnp
from jax.experimental import pallas as pl
from jax.experimental.pallas import tpu as pltpu

_NEG_INF = -1e30  # additive mask; never wins the max on a valid column


def _fused_cnn_kernel(x_ref, w_ref, b_ref, mask_ref, o_ref, *, taps, lout_pad):
    """Fused multi-branch Conv1d + ReLU + global MaxPool for one batch block.

    x_ref:    (B_blk, L_pad, D)   zero-padded input tile, channels-last, f32
    w_ref:    (taps*D, NFp)       packed conv weights (tap-major rows), f32
    b_ref:    (1, NFp)            packed conv bias, f32
    mask_ref: (lout_pad, NFp)     additive mask (-1e30 at invalid/pad steps)
    o_ref:    (B_blk, NFp)        pooled features for this batch block
    """
    bb = x_ref.shape[0]
    d = x_ref.shape[2]
    x = x_ref[...]                                           # (bb, L_pad, D)

    # im2col built in registers (no VMEM scratch round trip):
    #   lhs[b, t, k*D + d] = x[b, t + k, d]
    # Shifted slices are always in range because the wrapper zero-pads time to
    # L_pad = lout_pad + taps - 1; padded reads only feed masked rows or
    # zero-weight taps, so results are unchanged.
    parts = [x[:, k:k + lout_pad, :] for k in range(taps)]   # static -> unrolled
    lhs = jnp.concatenate(parts, axis=-1)                    # (bb, lout_pad, taps*D)
    lhs = lhs.reshape(bb * lout_pad, taps * d)               # tile-aligned: lout_pad % 8 == 0

    # One f32 MXU matmul for every branch:
    #   (bb*lout_pad, taps*D) @ (taps*D, NFp) -> (bb*lout_pad, NFp)
    acc = jax.lax.dot_general(
        lhs, w_ref[...],
        dimension_numbers=(((1,), (0,)), ((), ())),
        preferred_element_type=jnp.float32)

    # Mask per-branch-invalid and sublane-padding time steps, then per-element
    # global max-pool over time (tile-aligned reshape, cross-sublane max).
    acc = acc.reshape(bb, lout_pad, -1) + mask_ref[...][None]
    pooled = jnp.max(acc, axis=1)                            # (bb, NFp)

    # Bias + ReLU after the pool (== ReLU-before-pool by monotonicity).
    o_ref[...] = jnp.maximum(pooled + b_ref[...], 0.0)


def pack_params(params, max_byte_len):
    """Pack per-branch (w:(h,D,F), b:(F,)) params into fused kernel operands."""
    hs = [int(w.shape[0]) for (w, _) in params]
    D = int(params[0][0].shape[1])
    Fs = [int(w.shape[2]) for (w, _) in params]
    NF = sum(Fs)
    NFp = max(128, ((NF + 127) // 128) * 128)          # lane-dense output width
    taps = max(hs)
    assert max_byte_len >= taps, "need Lout >= 1 for every kernel size"
    lout_max = max_byte_len - min(hs) + 1
    lout_pad = ((lout_max + 7) // 8) * 8               # sublane-aligned pool window
    L_pad = lout_pad + taps - 1                        # every tap slice stays in range

    rhs = np.zeros((taps * D, NFp), np.float32)
    bias = np.zeros((1, NFp), np.float32)
    lout_col = np.full((NFp,), lout_max, np.int64)
    col = 0
    for (w, b) in params:
        h, d, f = (int(s) for s in w.shape)
        assert d == D
        rhs[:h * D, col:col + f] = np.asarray(w, np.float32).reshape(h * D, f)
        bias[0, col:col + f] = np.asarray(b, np.float32)
        lout_col[col:col + f] = max_byte_len - h + 1
        col += f

    # Additive mask: 0 on valid time steps for each column's branch, -1e30 on
    # per-branch-invalid positions and the sublane-padding rows.
    mask = np.where(np.arange(lout_pad)[:, None] < lout_col[None, :],
                    0.0, _NEG_INF).astype(np.float32)

    meta = dict(L=int(max_byte_len), L_pad=int(L_pad), D=D, NF=NF, NFp=NFp,
                taps=taps, lout_pad=int(lout_pad))
    return (jnp.asarray(rhs), jnp.asarray(bias), jnp.asarray(mask), meta)


def _batch_blocking(B, lout_pad, target_rows=256):
    """Pick (B_blk, B_pad): sublane-aligned batch block sized for MXU fill."""
    b8 = -(-B // 8) * 8                                # batch rounded to sublane mult.
    if b8 * lout_pad <= 2 * target_rows:
        bb = b8                                        # whole batch in one grid step
    else:
        bb = max(8, (target_rows // lout_pad) // 8 * 8)
    b_pad = -(-b8 // bb) * bb
    return bb, b_pad


def one_dim_cnn_forward(x, packed):
    """Full OneDimCNN forward. x:(B,L,D) -> (B, filters*len(kernel_sizes))."""
    rhs, bias, mask, meta = packed
    B, L, D = x.shape
    assert L == meta["L"] and D == meta["D"]
    taps, lout_pad, L_pad = meta["taps"], meta["lout_pad"], meta["L_pad"]
    NF, NFp = meta["NF"], meta["NFp"]

    B_blk, B_pad = _batch_blocking(B, lout_pad)

    # Zero-pad batch (sublane alignment / block divisibility) and time (so each
    # tap's shifted slice [k : k+lout_pad] stays in range).  Padded rows only
    # feed masked output positions or zero-weight taps, so results match.
    x_p = jnp.pad(x.astype(jnp.float32),
                  ((0, B_pad - B), (0, L_pad - L), (0, 0)))

    kernel = functools.partial(_fused_cnn_kernel, taps=taps, lout_pad=lout_pad)

    flops = 2 * B_pad * lout_pad * (taps * D) * NFp
    bytes_accessed = (x_p.size * 4 + rhs.size * 4 + bias.size * 4
                      + mask.size * 4 + B_pad * NFp * 4)

    out = pl.pallas_call(
        kernel,
        out_shape=jax.ShapeDtypeStruct((B_pad, NFp), jnp.float32),
        grid=(B_pad // B_blk,),
        in_specs=[
            pl.BlockSpec((B_blk, L_pad, D), lambda i: (i, 0, 0)),   # batch tile
            pl.BlockSpec((taps * D, NFp), lambda i: (0, 0)),        # packed weights
            pl.BlockSpec((1, NFp), lambda i: (0, 0)),               # packed bias
            pl.BlockSpec((lout_pad, NFp), lambda i: (0, 0)),        # time mask
        ],
        out_specs=pl.BlockSpec((B_blk, NFp), lambda i: (i, 0)),
        compiler_params=pltpu.CompilerParams(
            dimension_semantics=("parallel",)),                     # v7x: 2 TCs
        cost_estimate=pl.CostEstimate(flops=flops, transcendentals=0,
                                      bytes_accessed=bytes_accessed),
    )(x_p, rhs, bias, mask)

    out = out[:B, :NF]        # drop batch/lane padding; == .view(-1, C)
    return out                # dropout == identity (eval)


def _reference_forward(x, params):
    """Pure-JAX f32 reference for correctness checking."""
    outs = []
    for w, b in params:
        h = w.shape[0]
        L = x.shape[1]
        Lout = L - h + 1
        acc = sum(
            jnp.einsum("bld,df->blf", x[:, k:k + Lout, :], w[k])
            for k in range(h)
        )
        acc = jnp.maximum(acc + b[None, None, :], 0.0)
        outs.append(jnp.max(acc, axis=1))
    return jnp.concatenate(outs, axis=1)


if __name__ == "__main__":
    # Config (small, consistent with the module):
    #   d_dim=8, max_byte_len=16, filters=16, kernel_size=(3,4,5), dropout=0.1
    B, L, D = 2, 16, 8
    FILTERS = 16
    KERNEL_SIZES = (3, 4, 5)

    key = jax.random.PRNGKey(0)
    kx, *kws = jax.random.split(key, 1 + 2 * len(KERNEL_SIZES))

    x = jax.random.normal(kx, (B, L, D), dtype=jnp.float32)

    params = []
    for i, h in enumerate(KERNEL_SIZES):
        kw, kb = kws[2 * i], kws[2 * i + 1]
        fan_in = D * h
        bound = 1.0 / (fan_in ** 0.5)
        w = jax.random.uniform(kw, (h, D, FILTERS), jnp.float32, -bound, bound)
        b = jax.random.uniform(kb, (FILTERS,), jnp.float32, -bound, bound)
        params.append((w, b))

    packed = pack_params(params, max_byte_len=L)
    out = one_dim_cnn_forward(x, packed)
    out = jax.block_until_ready(out)

    ref = _reference_forward(x, params)
    assert out.shape == (B, FILTERS * len(KERNEL_SIZES)), out.shape
    assert jnp.allclose(out, ref, atol=2e-2, rtol=2e-2), "mismatch vs reference"

    print("KERNEL_OK")
</pallas_src>

<mosaic_0001>
module attributes {stable_mosaic.version = 11 : i64} {
  func.func @_fused_cnn_kernel(%arg0: i32, %arg1: memref<8x20x8xf32, #tpu.memory_space<vmem>>, %arg2: memref<40x128xf32, #tpu.memory_space<vmem>>, %arg3: memref<1x128xf32, #tpu.memory_space<vmem>>, %arg4: memref<16x128xf32, #tpu.memory_space<vmem>>, %arg5: memref<8x128xf32, #tpu.memory_space<vmem>>) attributes {dimension_semantics = [#tpu.dimension_semantics<parallel>], iteration_bounds = array<i64: 1>, scalar_prefetch = 0 : i64, scratch_operands = 0 : i64, tpu.core_type = #tpu.core_type<tc>, window_params = [{transform_indices = @transform_0, window_bounds = array<i64: 8, 20, 8>}, {pipeline_mode = #tpu.pipeline_mode<synchronous>, transform_indices = @transform_1, window_bounds = array<i64: 40, 128>}, {pipeline_mode = #tpu.pipeline_mode<synchronous>, transform_indices = @transform_2, window_bounds = array<i64: 1, 128>}, {pipeline_mode = #tpu.pipeline_mode<synchronous>, transform_indices = @transform_3, window_bounds = array<i64: 16, 128>}, {transform_indices = @transform_4, window_bounds = array<i64: 8, 128>}]} {
    %c0 = arith.constant 0 : index
    %c0_0 = arith.constant 0 : index
    %c0_1 = arith.constant 0 : index
    %0 = vector.load %arg1[%c0, %c0_0, %c0_1] : memref<8x20x8xf32, #tpu.memory_space<vmem>>, vector<8x20x8xf32>
    %1 = vector.extract_strided_slice %0 {offsets = [0, 0, 0], sizes = [8, 16, 8], strides = [1, 1, 1]} : vector<8x20x8xf32> to vector<8x16x8xf32>
    %2 = vector.extract_strided_slice %0 {offsets = [0, 1, 0], sizes = [8, 16, 8], strides = [1, 1, 1]} : vector<8x20x8xf32> to vector<8x16x8xf32>
    %3 = vector.extract_strided_slice %0 {offsets = [0, 2, 0], sizes = [8, 16, 8], strides = [1, 1, 1]} : vector<8x20x8xf32> to vector<8x16x8xf32>
    %4 = vector.extract_strided_slice %0 {offsets = [0, 3, 0], sizes = [8, 16, 8], strides = [1, 1, 1]} : vector<8x20x8xf32> to vector<8x16x8xf32>
    %5 = vector.extract_strided_slice %0 {offsets = [0, 4, 0], sizes = [8, 16, 8], strides = [1, 1, 1]} : vector<8x20x8xf32> to vector<8x16x8xf32>
    %6 = tpu.concatenate %1, %2, %3, %4, %5 in 2 : vector<8x16x8xf32>, vector<8x16x8xf32>, vector<8x16x8xf32>, vector<8x16x8xf32>, vector<8x16x8xf32> -> vector<8x16x40xf32>
    %7 = vector.shape_cast %6 : vector<8x16x40xf32> to vector<128x40xf32>
    %c0_2 = arith.constant 0 : index
    %c0_3 = arith.constant 0 : index
    %8 = vector.load %arg2[%c0_2, %c0_3] : memref<40x128xf32, #tpu.memory_space<vmem>>, vector<40x128xf32>
    %cst = arith.constant dense<0.000000e+00> : vector<128x128xf32>
    %9 = tpu.matmul %7, %8, %cst {dimension_numbers = #tpu.dot_dimension_numbers<[1], [0], [0], [1], [0, 0, 1, 1], [], []>} : vector<128x40xf32>, vector<40x128xf32>, vector<128x128xf32> -> vector<128x128xf32>
    %10 = vector.shape_cast %9 : vector<128x128xf32> to vector<8x16x128xf32>
    %c0_4 = arith.constant 0 : index
    %c0_5 = arith.constant 0 : index
    %11 = vector.load %arg4[%c0_4, %c0_5] : memref<16x128xf32, #tpu.memory_space<vmem>>, vector<16x128xf32>
    %12 = vector.shape_cast %11 : vector<16x128xf32> to vector<1x16x128xf32>
    %13 = vector.broadcast %12 : vector<1x16x128xf32> to vector<8x16x128xf32>
    %14 = arith.addf %10, %13 : vector<8x16x128xf32>
    %cst_6 = arith.constant dense<0xFF800000> : vector<8x128xf32>
    %15 = vector.multi_reduction <maximumf>, %14, %cst_6 [1] : vector<8x16x128xf32> to vector<8x128xf32>
    %c0_7 = arith.constant 0 : index
    %c0_8 = arith.constant 0 : index
    %16 = vector.load %arg3[%c0_7, %c0_8] : memref<1x128xf32, #tpu.memory_space<vmem>>, vector<1x128xf32>
    %17 = vector.broadcast %16 : vector<1x128xf32> to vector<8x128xf32>
    %18 = arith.addf %15, %17 : vector<8x128xf32>
    %cst_9 = arith.constant 0.000000e+00 : f32
    %19 = vector.broadcast %cst_9 : f32 to vector<8x128xf32>
    %20 = arith.maximumf %18, %19 : vector<8x128xf32>
    %c0_10 = arith.constant 0 : index
    %c0_11 = arith.constant 0 : index
    %21 = vector.load %arg5[%c0_10, %c0_11] : memref<8x128xf32, #tpu.memory_space<vmem>>, vector<8x128xf32>
    tpu.vector_store %arg5[%c0_10, %c0_11], %20 {strides = array<i32>} : memref<8x128xf32, #tpu.memory_space<vmem>>, vector<8x128xf32>,
    return
  }
  func.func @transform_0(%arg0: i32) -> (i32, i32, i32) {
    %c0_i32 = arith.constant 0 : i32
    %c0_i32_0 = arith.constant 0 : i32
    %c0_i32_1 = arith.constant 0 : i32
    return %arg0, %c0_i32, %c0_i32_0 : i32, i32, i32
  }
  func.func @transform_1(%arg0: i32) -> (i32, i32) {
    %c0_i32 = arith.constant 0 : i32
    %c0_i32_0 = arith.constant 0 : i32
    %c0_i32_1 = arith.constant 0 : i32
    return %c0_i32, %c0_i32_0 : i32, i32
  }
  func.func @transform_2(%arg0: i32) -> (i32, i32) {
    %c0_i32 = arith.constant 0 : i32
    %c0_i32_0 = arith.constant 0 : i32
    %c0_i32_1 = arith.constant 0 : i32
    return %c0_i32, %c0_i32_0 : i32, i32
  }
  func.func @transform_3(%arg0: i32) -> (i32, i32) {
    %c0_i32 = arith.constant 0 : i32
    %c0_i32_0 = arith.constant 0 : i32
    %c0_i32_1 = arith.constant 0 : i32
    return %c0_i32, %c0_i32_0 : i32, i32
  }
  func.func @transform_4(%arg0: i32) -> (i32, i32) {
    %c0_i32 = arith.constant 0 : i32
    %c0_i32_0 = arith.constant 0 : i32
    return %arg0, %c0_i32 : i32, i32
  }
}

</mosaic_0001>

<bundles_post_ra>
// kernel: tpu_custom_call.1
= control target key start
LH: loop header
LB: loop body
LE: loop exit
PB: predicated region body
PF: predicated region fallthrough
CT: control target
= control target key end

     0   :  { %vm66_vm0 = vcmask 1046528   ;;  %vm244_vm1 = vcmask 1044480   ;;  %s813_s27 = smov 8   ;;  %s1403_s0 = inlined_call_operand.vmem [shape: f32[8,20,8], index: 0, kind: input, shape index: {}]   ;;  %s1404_s1 = inlined_call_operand.vmem [shape: f32[40,128], index: 1, kind: input, shape index: {}]   ;;  %s1405_s2 = inlined_call_operand.vmem [shape: f32[1,128], index: 2, kind: input, shape index: {}]   ;;  %s1406_s3 = inlined_call_operand.vmem [shape: f32[16,128], index: 3, kind: input, shape index: {}]   ;;  %s1407_s4 = inlined_call_operand.hbm [shape: f32[8,128], index: 4, kind: output, shape index: {}]  }
   0x1   :  { %v846_v0 = vld [vmem:[%s1403_s0 + $0x60] sm:$0xff]  ;;  %v851_v1 = vld [vmem:[%s1403_s0 + $0x68] sm:$0xff]  ;;  %v874_v10 = vld [vmem:[%s1403_s0 + $0x90] sm:$0xff] }
   0x2   :  { %v856_v2 = vld [vmem:[%s1403_s0] sm:$0xff]  ;;  %v87_v3 = vrot.slane %v846_v0, 1  ;;  %v88_v4 = vrot.slane %v851_v1, 1  ;;  %v863_v5 = vld [vmem:[%s1403_s0 + $0x8] sm:$0xff]  ;;  %v265_v8 = vrot.slane %v846_v0, 3  ;;  %v879_v11 = vld [vmem:[%s1403_s0 + $0x98] sm:$0xff] }
   0x3   :  { %v67_v6 = vrot.slane %v856_v2, 1  ;;  %v68_v7 = vrot.slane %v863_v5, 1  ;;  %v266_v12 = vrot.slane %v851_v1, 3  ;;  %v176_v14 = vrot.slane %v846_v0, 2 }
   0x4   :  { %v89_v9 = vsel %vm66_vm0, %v87_v3, %v88_v4  ;;  %v177_v15 = vrot.slane %v851_v1, 2 }
   0x5   :  { %123 = vrot.lane.b32.xlu0 %v89_v9, %s813_s27  ;;  %v69_v13 = vsel %vm66_vm0, %v67_v6, %v68_v7  ;;  %v267_v16 = vsel %vm244_vm1, %v265_v8, %v266_v12 }
   0x6   :  { %107 = vrot.lane.b32.xlu1 %v69_v13, %s813_s27 }
   0x7   :  { %9 = vsyncpa [#allocation3], 0  ;;  %vm155_vm2 = vcmask 1045504   ;;  %v97_v17 = vrot.slane %v874_v10, 1  ;;  %v98_v18 = vrot.slane %v879_v11, 1  ;;  %s814_s28 = smov 24  }
   0x8   :  { %301 = vrot.lane.b32.xlu2 %v267_v16, %s814_s28  ;;  %v156_v19 = vrot.slane %v856_v2, 2  ;;  %v157_v20 = vrot.slane %v863_v5, 2  ;;  %v178_v21 = vsel %vm155_vm2, %v176_v14, %v177_v15  ;;  %s815_s29 = smov 16   ;;  %v910_v24 = vld [vmem:[%s1403_s0 + $0x30] sm:$0xff]  ;;  %v915_v25 = vld [vmem:[%s1403_s0 + $0x38] sm:$0xff]  ;;  %v186_v26 = vrot.slane %v874_v10, 2 }
   0x9   :  { %v99_v22 = vsel %vm66_vm0, %v97_v17, %v98_v18  ;;  %v187_v27 = vrot.slane %v879_v11, 2  ;;  %v354_v28 = vrot.slane %v846_v0, 4  ;;  %v355_v29 = vrot.slane %v851_v1, 4  ;;  %s816_s8 = smov 32   ;;  %v32_v52 = vld [vmem:[%s1403_s0 + $0x70] sm:$0xf] }
   0xa   :  { %v158_v23 = vsel %vm155_vm2, %v156_v19, %v157_v20  ;;  %vm333_vm3 = vcmask 1043456   ;;  %v77_v30 = vrot.slane %v910_v24, 1  ;;  %v78_v31 = vrot.slane %v915_v25, 1  ;;  %v20_v60 = vld [vmem:[%s1403_s0 + $0x10] sm:$0xf]  ;;  %s741_s9 = sshll.u32 %s1407_s4, 4  ;;  %s742_s9 = int_to_ptr.hbm [resolvable:$true] %s741_s9 }
   0xb   :  { %v188_v32 = vsel %vm155_vm2, %v186_v26, %v187_v27  ;;  %v356_v33 = vsel %vm333_vm3, %v354_v28, %v355_v29  ;;  %v245_v35 = vrot.slane %v856_v2, 3  ;;  %v246_v36 = vrot.slane %v863_v5, 3  ;;  %v38_v61 = vld [vmem:[%s1403_s0 + $0xa0] sm:$0xf] }
   0xc   :  { %v79_v34 = vsel %vm66_vm0, %v77_v30, %v78_v31  ;;  %v275_v37 = vrot.slane %v874_v10, 3  ;;  %v276_v38 = vrot.slane %v879_v11, 3  ;;  %v166_v39 = vrot.slane %v910_v24, 2 }
   0xd   :  { %212 = vrot.lane.b32.xlu0 %v178_v21, %s815_s29  ;;  %v167_v40 = vrot.slane %v915_v25, 2  ;;  %v247_v41 = vsel %vm244_vm1, %v245_v35, %v246_v36  ;;  %v334_v44 = vrot.slane %v856_v2, 4  ;;  %v335_v45 = vrot.slane %v863_v5, 4  ;;  %v1037_v35 = vld [vmem:[%s1403_s0 + $0x80] sm:$0xff] }
   0xe   :  { %131 = vrot.lane.b32.xlu1 %v99_v22, %s813_s27  ;;  %v277_v42 = vsel %vm244_vm1, %v275_v37, %v276_v38  ;;  %v364_v46 = vrot.slane %v874_v10, 4  ;;  %v365_v47 = vrot.slane %v879_v11, 4  ;;  %v255_v48 = vrot.slane %v910_v24, 3 }
   0xf   :  { %v168_v43 = vsel %vm155_vm2, %v166_v39, %v167_v40  ;;  %v256_v49 = vrot.slane %v915_v25, 3  ;;  %v336_v50 = vsel %vm333_vm3, %v334_v44, %v335_v45  ;;  %v344_v54 = vrot.slane %v910_v24, 4  ;;  %v1067_v44 = vld [vmem:[%s1403_s0 + $0xb0] sm:$0xff] }
  0x10   :  { %196 = vrot.lane.b32.xlu2 %v158_v23, %s815_s29  ;;  %v366_v51 = vsel %vm333_vm3, %v364_v46, %v365_v47  ;;  %v345_v55 = vrot.slane %v915_v25, 4  ;;  %v90_v56 = vrot.slane %v32_v52, 1  ;;  %v179_v57 = vrot.slane %v32_v52, 2 }
  0x11   :  { %v257_v53 = vsel %vm244_vm1, %v255_v48, %v256_v49  ;;  %v70_v63 = vrot.slane %v20_v60, 1  ;;  %v100_v3 = vrot.slane %v38_v61, 1  ;;  %v159_v13 = vrot.slane %v20_v60, 2 }
  0x12   :  { %v346_v58 = vsel %vm333_vm3, %v344_v54, %v345_v55  ;;  %v91_v59 = vsel %vm66_vm0, %v88_v4, %v90_v56  ;;  %v180_v62 = vsel %vm155_vm2, %v177_v15, %v179_v57  ;;  %v268_v4 = vrot.slane %v32_v52, 3 }
  0x13   :  { %v71_v6 = vsel %vm66_vm0, %v68_v7, %v70_v63  ;;  %v101_v8 = vsel %vm66_vm0, %v98_v18, %v100_v3  ;;  %v189_v14 = vrot.slane %v38_v61, 2  ;;  %v357_v15 = vrot.slane %v32_v52, 4  ;;  %v492_v3 = vld [vmem:[%s1404_s1 + $0x10] sm:$0xff] }
  0x14   :  { %v269_v9 = vsel %vm244_vm1, %v266_v12, %v268_v4  ;;  %v160_v7 = vsel %vm155_vm2, %v157_v20, %v159_v13  ;;  %v26_v12 = vld [vmem:[%s1403_s0 + $0x40] sm:$0xf]  ;;  %v248_v19 = vrot.slane %v20_v60, 3  ;;  %v278_v20 = vrot.slane %v38_v61, 3 }
  0x15   :  { %220 = vrot.lane.b32.xlu0 %v188_v32, %s815_s29  ;;  %v190_v16 = vsel %vm155_vm2, %v187_v27, %v189_v14  ;;  %v358_v17 = vsel %vm333_vm3, %v355_v29, %v357_v15  ;;  %v80_v18 = vrot.slane %v26_v12, 1  ;;  %v169_v26 = vrot.slane %v26_v12, 2  ;;  %v491_v15 = vld [vmem:[%s1404_s1 + $0x8] sm:$0xff] }
  0x16   :  { %390 = vrot.lane.b32.xlu1 %v356_v33, %s816_s8  ;;  %v249_v22 = vsel %vm244_vm1, %v246_v36, %v248_v19  ;;  %v279_v23 = vsel %vm244_vm1, %v276_v38, %v278_v20  ;;  %v337_v27 = vrot.slane %v20_v60, 4  ;;  %v367_v28 = vrot.slane %v38_v61, 4  ;;  %v494_v60 = vld [vmem:[%s1404_s1 + $0x20] sm:$0xff] }
  0x17   :  { %v81_v21 = vsel %vm66_vm0, %v78_v31, %v80_v18  ;;  %v170_v29 = vsel %vm155_vm2, %v167_v40, %v169_v26  ;;  %v258_v32 = vrot.slane %v26_v12, 3  ;;  %v347_v33 = vrot.slane %v26_v12, 4  ;;  %v1048_v40 = vld [vmem:[%s1403_s0 + $0x18] sm:$0xff]  ;;  %767 = vmatpush.msra.mxu2 %v494_v60  ;;  %555 = vmatpush.msra.mxu0 %v494_v60  ;;  %v490_v18 = vld [vmem:[%s1404_s1] sm:$0xff] }
  0x18   :  { %115 = vrot.lane.b32.xlu2 %v79_v34, %s813_s27  ;;  %v338_v30 = vsel %vm333_vm3, %v335_v45, %v337_v27  ;;  %v368_v31 = vsel %vm333_vm3, %v365_v47, %v367_v28  ;;  %v1032_v34 = vld [vmem:[%s1403_s0 + $0x78] sm:$0xff]  ;;  %v93_v37 = vrot.slane %v1037_v35, 1  ;;  %v182_v46 = vrot.slane %v1037_v35, 2  ;;  %768 = vmatpush.msra.mxu3 %v494_v60 }
  0x19   :  { %v92_v36 = vrot.slane %v1032_v34, 1  ;;  %v259_v38 = vsel %vm244_vm1, %v256_v49, %v258_v32  ;;  %v348_v39 = vsel %vm333_vm3, %v345_v55, %v347_v33  ;;  %v181_v45 = vrot.slane %v1032_v34, 2  ;;  %766 = vmatpush.msra.mxu1 %v494_v60 }
  0x1a   :  { %v72_v47 = vrot.slane %v1048_v40, 1  ;;  %v270_v54 = vrot.slane %v1032_v34, 3  ;;  %v271_v55 = vrot.slane %v1037_v35, 3  ;;  %v161_v56 = vrot.slane %v1048_v40, 2 }
  0x1b   :  { %v359_v13 = vrot.slane %v1032_v34, 4  ;;  %v360_v14 = vrot.slane %v1037_v35, 4  ;;  %v250_v12 = vrot.slane %v1048_v40, 3  ;;  %v281_v26 = vrot.slane %v1067_v44, 3 }
  0x1c   :  { %v272_v63 = vsel %vm244_vm1, %v270_v54, %v271_v55  ;;  %vm422_vm4 = vcmask 64512   ;;  %vm439_vm5 = vcmask 130048   ;;  %vm456_vm6 = vcmask 195584  }
  0x1d   :  { %285 = vrot.lane.b32.xlu0 %v247_v41, %s814_s28  ;;  %v1053_v41 = vld [vmem:[%s1403_s0 + $0x20] sm:$0xff]  ;;  %v361_v20 = vsel %vm333_vm3, %v359_v13, %v360_v14  ;;  %vm473_vm7 = vcmask 261120   ;;  %vm495_vm8 = vcmask 326656   ;;  %vm712_vm9 = vcmask 1041409  }
  0x1e   :  { %309 = vrot.lane.b32.xlu1 %v277_v42, %s814_s28  ;;  %v94_v42 = vsel %vm66_vm0, %v92_v36, %v93_v37  ;;  %v73_v48 = vrot.slane %v1053_v41, 1  ;;  %v162_v57 = vrot.slane %v1053_v41, 2  ;;  %vm715_vm10 = vcmask 1042434  }
  0x1f   :  { %vm718_vm11 = vcmask 1043459   ;;  %vm721_vm12 = vcmask 1044484   ;;  %vm724_vm13 = vcmask 1045509   ;;  %vm727_vm14 = vcmask 1046534  }
  0x20   :  { %204 = vrot.lane.b32.xlu2 %v168_v43, %s815_s29  ;;  %v1062_v43 = vld [vmem:[%s1403_s0 + $0xa8] sm:$0xff]  ;;  %v74_v52 = vsel %vm66_vm0, %v72_v47, %v73_v48  ;;  %v163_v4 = vsel %vm155_vm2, %v161_v56, %v162_v57  ;;  %vm730_vm15 = vcmask 1047559  }
  0x21   :  { %v102_v49 = vrot.slane %v1062_v43, 1 }
  0x25   :  { %374 = vrot.lane.b32.xlu0 %v336_v50, %s816_s8  ;;  %v103_v50 = vrot.slane %v1067_v44, 1 }
  0x26   :  { %398 = vrot.lane.b32.xlu1 %v366_v51, %s816_s8  ;;  %v183_v51 = vsel %vm155_vm2, %v181_v45, %v182_v46 }
  0x28   :  { %293 = vrot.lane.b32.xlu2 %v257_v53, %s814_s28  ;;  %v104_v53 = vsel %vm66_vm0, %v102_v49, %v103_v50 }
  0x2d   :  { %382 = vrot.lane.b32.xlu0 %v346_v58, %s816_s8  ;;  %v191_v58 = vrot.slane %v1062_v43, 2 }
  0x2e   :  { %125 = vrot.lane.b32.xlu1 %v91_v59, %s813_s27  ;;  %v192_v59 = vrot.slane %v1067_v44, 2 }
  0x30   :  { %214 = vrot.lane.b32.xlu2 %v180_v62, %s815_s29  ;;  %v493_v62 = vld [vmem:[%s1404_s1 + $0x18] sm:$0xff] }
  0x31   :  { %770 = vmatpush.msra.mxu2 %v493_v62  ;;  %556 = vmatpush.msra.mxu0 %v493_v62 }
  0x32   :  { %771 = vmatpush.msra.mxu3 %v493_v62  ;;  %769 = vmatpush.msra.mxu1 %v493_v62  ;;  %v1198_v62 = vld [vmem:[%s1403_s0 + $0x28] sm:$0xf] }
  0x33   :  { %773 = vmatpush.msra.mxu2 %v492_v3  ;;  %557 = vmatpush.msra.mxu0 %v492_v3  ;;  %v75_v13 = vrot.slane %v1198_v62, 1 }
  0x34   :  { %774 = vmatpush.msra.mxu3 %v492_v3  ;;  %772 = vmatpush.msra.mxu1 %v492_v3 }
  0x35   :  { %109 = vrot.lane.b32.xlu0 %v71_v6, %s813_s27  ;;  %v1115_v6 = vld [vmem:[%s1403_s0 + $0x48] sm:$0xff]  ;;  %776 = vmatpush.msra.mxu2 %v491_v15 }
  0x36   :  { %133 = vrot.lane.b32.xlu1 %v101_v8, %s813_s27  ;;  %v1120_v8 = vld [vmem:[%s1403_s0 + $0x50] sm:$0xff]  ;;  %558 = vmatpush.msra.mxu0 %v491_v15  ;;  %v171_v27 = vrot.slane %v1115_v6, 2  ;;  %v260_v45 = vrot.slane %v1115_v6, 3 }
  0x37   :  { %779 = vmatpush.msra.mxu2 %v490_v18  ;;  %777 = vmatpush.msra.mxu3 %v491_v15  ;;  %v172_v28 = vrot.slane %v1120_v8, 2  ;;  %v261_v47 = vrot.slane %v1120_v8, 3 }
  0x38   :  { %303 = vrot.lane.b32.xlu2 %v269_v9, %s814_s28  ;;  %v193_v9 = vsel %vm155_vm2, %v191_v58, %v192_v59  ;;  %559 = vmatpush.msra.mxu0 %v490_v18  ;;  %v35_v58 = vld [vmem:[%s1403_s0 + $0x88] sm:$0xf] }
  0x39   :  { %775 = vmatpush.msra.mxu1 %v491_v15  ;;  %780 = vmatpush.msra.mxu3 %v490_v18  ;;  %v173_v33 = vsel %vm155_vm2, %v171_v27, %v172_v28  ;;  %v262_v56 = vsel %vm244_vm1, %v260_v45, %v261_v47  ;;  %v362_v45 = vrot.slane %v35_v58, 4 }
  0x3b   :  { %778 = vmatpush.msra.mxu1 %v490_v18  ;;  %v1214_v18 = vld [vmem:[%s1403_s0 + $0xb8] sm:$0xf] }
  0x3d   :  { %198 = vrot.lane.b32.xlu0 %v160_v7, %s815_s29  ;;  %v82_v7 = vrot.slane %v1115_v6, 1 }
  0x3e   :  { %222 = vrot.lane.b32.xlu1 %v190_v16, %s815_s29  ;;  %v83_v16 = vrot.slane %v1120_v8, 1 }
  0x40   :  { %392 = vrot.lane.b32.xlu2 %v358_v17, %s816_s8  ;;  %v251_v17 = vrot.slane %v1053_v41, 3 }
  0x45   :  { %117 = vrot.lane.b32.xlu0 %v81_v21, %s813_s27  ;;  %v84_v21 = vsel %vm66_vm0, %v82_v7, %v83_v16 }
  0x46   :  { %287 = vrot.lane.b32.xlu1 %v249_v22, %s814_s28  ;;  %v252_v22 = vsel %vm244_vm1, %v250_v12, %v251_v17 }
  0x48   :  { %311 = vrot.lane.b32.xlu2 %v279_v23, %s814_s28  ;;  %v280_v23 = vrot.slane %v1062_v43, 3 }
  0x4a   :  { %v282_v32 = vsel %vm244_vm1, %v280_v23, %v281_v26  ;;  %v273_v23 = vrot.slane %v35_v58, 3 }
  0x4d   :  { %206 = vrot.lane.b32.xlu0 %v170_v29, %s815_s29  ;;  %v339_v29 = vrot.slane %v1048_v40, 4 }
  0x4e   :  { %376 = vrot.lane.b32.xlu1 %v338_v30, %s816_s8  ;;  %v340_v30 = vrot.slane %v1053_v41, 4 }
  0x50   :  { %400 = vrot.lane.b32.xlu2 %v368_v31, %s816_s8  ;;  %v341_v36 = vsel %vm333_vm3, %v339_v29, %v340_v30 }
  0x55   :  { %295 = vrot.lane.b32.xlu0 %v259_v38, %s814_s28  ;;  %v369_v38 = vrot.slane %v1062_v43, 4 }
  0x56   :  { %384 = vrot.lane.b32.xlu1 %v348_v39, %s816_s8  ;;  %v370_v39 = vrot.slane %v1067_v44, 4 }
  0x58   :  { %127 = vrot.lane.b32.xlu2 %v94_v42, %s813_s27  ;;  %v371_v54 = vsel %vm333_vm3, %v369_v38, %v370_v39 }
  0x5d   :  { %216 = vrot.lane.b32.xlu0 %v183_v51, %s815_s29  ;;  %v349_v51 = vrot.slane %v1115_v6, 4 }
  0x5e   :  { %111 = vrot.lane.b32.xlu1 %v74_v52, %s813_s27  ;;  %v350_v52 = vrot.slane %v1120_v8, 4 }
  0x60   :  { %135 = vrot.lane.b32.xlu2 %v104_v53, %s813_s27  ;;  %v351_v60 = vsel %vm333_vm3, %v349_v51, %v350_v52 }
  0x62   :  { %v1098_v61 = vpop.permute.xlu2 %301 }
  0x65   :  { %305 = vrot.lane.b32.xlu0 %v272_v63, %s814_s28  ;;  %v95_v63 = vrot.slane %v35_v58, 1 }
  0x66   :  { %200 = vrot.lane.b32.xlu1 %v163_v4, %s815_s29  ;;  %v184_v4 = vrot.slane %v35_v58, 2 }
  0x67   :  { %v96_v7 = vsel %vm66_vm0, %v93_v37, %v95_v63  ;;  %v105_v37 = vrot.slane %v1214_v18, 1 }
  0x68   :  { %224 = vrot.lane.b32.xlu2 %v193_v9, %s815_s29  ;;  %v185_v12 = vsel %vm155_vm2, %v182_v46, %v184_v4 }
  0x6a   :  { %v1140_v19 = vpop.permute.xlu2 %196 }
  0x6d   :  { %394 = vrot.lane.b32.xlu0 %v361_v20, %s816_s8 }
  0x6e   :  { %119 = vrot.lane.b32.xlu1 %v84_v21, %s813_s27  ;;  %v76_v21 = vsel %vm66_vm0, %v73_v48, %v75_v13  ;;  %v164_v48 = vrot.slane %v1198_v62, 2 }
  0x70   :  { %289 = vrot.lane.b32.xlu2 %v252_v22, %s814_s28  ;;  %v165_v38 = vsel %vm155_vm2, %v162_v57, %v164_v48 }
  0x72   :  { %v1160_v31 = vpop.permute.xlu2 %115 }
  0x73   :  { %v427_v13 = vsel %vm422_vm4, %v910_v24, %v1160_v31  ;;  %v342_v31 = vrot.slane %v1198_v62, 4 }
  0x75   :  { %313 = vrot.lane.b32.xlu0 %v282_v32, %s814_s28 }
  0x76   :  { %208 = vrot.lane.b32.xlu1 %v173_v33, %s815_s29  ;;  %v106_v33 = vsel %vm66_vm0, %v103_v50, %v105_v37 }
  0x77   :  { %v124_v42 = vpop.permute.xlu0 %123 }
  0x78   :  { %378 = vrot.lane.b32.xlu2 %v341_v36, %s816_s8  ;;  %v108_v49 = vpop.permute.xlu1 %107  ;;  %v431_v20 = vsel %vm422_vm4, %v846_v0, %v124_v42  ;;  %v274_v36 = vsel %vm244_vm1, %v271_v55, %v273_v23  ;;  %v194_v42 = vrot.slane %v1214_v18, 2 }
  0x7a   :  { %v1180_v53 = vpop.permute.xlu2 %204  ;;  %v195_v57 = vsel %vm155_vm2, %v192_v59, %v194_v42 }
  0x7d   :  { %402 = vrot.lane.b32.xlu0 %v371_v54, %s816_s8 }
  0x7e   :  { %297 = vrot.lane.b32.xlu1 %v262_v56, %s814_s28  ;;  %v423_v56 = vsel %vm422_vm4, %v856_v2, %v108_v49  ;;  %v253_v2 = vrot.slane %v1198_v62, 3 }
  0x7f   :  { %v213_v3 = vpop.permute.xlu0 %212 }
  0x80   :  { %386 = vrot.lane.b32.xlu2 %v351_v60, %s816_s8  ;;  %v132_v9 = vpop.permute.xlu1 %131  ;;  %v448_v22 = vsel %vm439_vm5, %v431_v20, %v213_v3  ;;  %v363_v60 = vsel %vm333_vm3, %v360_v14, %v362_v45  ;;  %v440_v3 = vsel %vm439_vm5, %v423_v56, %v1140_v19  ;;  %v254_v20 = vsel %vm244_vm1, %v251_v17, %v253_v2 }
  0x81   :  { %v465_v27 = vsel %vm456_vm6, %v448_v22, %v1098_v61  ;;  %v1244_v61 = vld [vmem:[%s1403_s0 + $0x58] sm:$0xf]  ;;  %v435_v58 = vsel %vm422_vm4, %v874_v10, %v132_v9  ;;  %v283_v10 = vrot.slane %v1214_v18, 3  ;;  %v444_v22 = vsel %vm439_vm5, %v427_v13, %v1180_v53 }
  0x82   :  { %v1203_v15 = vpop.permute.xlu2 %293  ;;  %v85_v51 = vrot.slane %v1244_v61, 1  ;;  %v174_v19 = vrot.slane %v1244_v61, 2  ;;  %v263_v23 = vrot.slane %v1244_v61, 3 }
  0x83   :  { %v461_v17 = vsel %vm456_vm6, %v444_v22, %v1203_v15  ;;  %v343_v15 = vsel %vm333_vm3, %v340_v30, %v342_v31  ;;  %v352_v30 = vrot.slane %v1244_v61, 4 }
  0x84   :  { %v86_v63 = vsel %vm66_vm0, %v83_v16, %v85_v51  ;;  %v175_v24 = vsel %vm155_vm2, %v172_v28, %v174_v19 }
  0x85   :  { %129 = vrot.lane.b32.xlu0 %v96_v7, %s813_s27 }
  0x86   :  { %218 = vrot.lane.b32.xlu1 %v185_v12, %s815_s29 }
  0x87   :  { %v221_v46 = vpop.permute.xlu0 %220 }
  0x88   :  { %113 = vrot.lane.b32.xlu2 %v76_v21, %s813_s27  ;;  %v391_v0 = vpop.permute.xlu1 %390  ;;  %v452_v59 = vsel %vm439_vm5, %v435_v58, %v221_v46  ;;  %v284_v21 = vsel %vm244_vm1, %v281_v26, %v283_v10  ;;  %v372_v46 = vrot.slane %v1214_v18, 4 }
  0x89   :  { %v482_v29 = vsel %vm473_vm7, %v465_v27, %v391_v0 }
  0x8a   :  { %v215_v32 = vpop.permute.xlu2 %214  ;;  %758 = vmatmul.msk.f32.vlgmr.msra.gmra.mxu2 %vm495_vm8, %v482_v29  ;;  %v373_v27 = vsel %vm333_vm3, %v370_v39, %v372_v46  ;;  %v353_v39 = vsel %vm333_vm3, %v350_v52, %v352_v30 }
  0x8d   :  { %137 = vrot.lane.b32.xlu0 %v106_v33, %s813_s27 }
  0x8e   :  { %307 = vrot.lane.b32.xlu1 %v274_v36, %s814_s28 }
  0x8f   :  { %v286_v50 = vpop.permute.xlu0 %285 }
  0x90   :  { %202 = vrot.lane.b32.xlu2 %v165_v38, %s815_s29  ;;  %v310_v55 = vpop.permute.xlu1 %309  ;;  %v457_v14 = vsel %vm456_vm6, %v440_v3, %v286_v50 }
  0x91   :  { %v469_v16 = vsel %vm456_vm6, %v452_v59, %v310_v55 }
  0x92   :  { %v304_v54 = vpop.permute.xlu2 %303 }
  0x95   :  { %226 = vrot.lane.b32.xlu0 %v195_v57, %s815_s29 }
  0x96   :  { %396 = vrot.lane.b32.xlu1 %v363_v60, %s816_s8 }
  0x97   :  { %v375_v49 = vpop.permute.xlu0 %374 }
  0x98   :  { %121 = vrot.lane.b32.xlu2 %v86_v63, %s813_s27  ;;  %v399_v4 = vpop.permute.xlu1 %398  ;;  %v474_v9 = vsel %vm473_vm7, %v457_v14, %v375_v49 }
  0x99   :  { %750 = vmatmul.msk.f32.vlgmr.msra.gmra.mxu0 %vm495_vm8, %v474_v9  ;;  %v486_v7 = vsel %vm473_vm7, %v469_v16, %v399_v4 }
  0x9a   :  { %v393_v12 = vpop.permute.xlu2 %392  ;;  %762 = vmatmul.msk.f32.vlgmr.msra.gmra.mxu3 %vm495_vm8, %v486_v7 }
  0x9d   :  { %291 = vrot.lane.b32.xlu0 %v254_v20, %s814_s28 }
  0x9e   :  { %315 = vrot.lane.b32.xlu1 %v284_v21, %s814_s28 }
  0x9f   :  { %v383_v37 = vpop.permute.xlu0 %382 }
  0xa0   :  { %210 = vrot.lane.b32.xlu2 %v175_v24, %s815_s29  ;;  %v126_v26 = vpop.permute.xlu1 %125  ;;  %v478_v53 = vsel %vm473_vm7, %v461_v17, %v383_v37 }
  0xa1   :  { %v432_v28 = vsel %vm422_vm4, %v851_v1, %v126_v26  ;;  %754 = vmatmul.msk.f32.vlgmr.msra.gmra.mxu1 %vm495_vm8, %v478_v53  ;;  %v264_v1 = vsel %vm244_vm1, %v261_v47, %v263_v23 }
  0xa2   :  { %v312_v0 = vpop.permute.xlu2 %311  ;;  %v449_v62 = vsel %vm439_vm5, %v432_v28, %v215_v32 }
  0xa3   :  { %v466_v18 = vsel %vm456_vm6, %v449_v62, %v304_v54 }
  0xa4   :  { %v483_v48 = vsel %vm473_vm7, %v466_v18, %v393_v12 }
  0xa5   :  { %759 = vmatmul.msk.f32.gmra.mxu2 %vm495_vm8, %v483_v48  ;;  %380 = vrot.lane.b32.xlu0 %v343_v15, %s816_s8 }
  0xa6   :  { %404 = vrot.lane.b32.xlu1 %v373_v27, %s816_s8 }
  0xa7   :  { %v110_v29 = vpop.permute.xlu0 %109 }
  0xa8   :  { %299 = vrot.lane.b32.xlu2 %v264_v1, %s814_s28  ;;  %v134_v32 = vpop.permute.xlu1 %133  ;;  %v424_v52 = vsel %vm422_vm4, %v863_v5, %v110_v29 }
  0xa9   :  { %v436_v47 = vsel %vm422_vm4, %v879_v11, %v134_v32 }
  0xaa   :  { %v401_v33 = vpop.permute.xlu2 %400 }
  0xad   :  { %388 = vrot.lane.b32.xlu0 %v353_v39, %s816_s8 }
  0xaf   :  { %v199_v36 = vpop.permute.xlu0 %198 }
  0xb0   :  { %v223_v38 = vpop.permute.xlu1 %222  ;;  %v441_v57 = vsel %vm439_vm5, %v424_v52, %v199_v36 }
  0xb1   :  { %v453_v42 = vsel %vm439_vm5, %v436_v47, %v223_v38 }
  0xb2   :  { %v128_v50 = vpop.permute.xlu2 %127  ;;  %v470_v61 = vsel %vm456_vm6, %v453_v42, %v312_v0 }
  0xb3   :  { %v487_v45 = vsel %vm473_vm7, %v470_v61, %v401_v33  ;;  %v433_v20 = vsel %vm422_vm4, %v1032_v34, %v128_v50 }
  0xb4   :  { %763 = vmatmul.msk.f32.gmra.mxu3 %vm495_vm8, %v487_v45 }
  0xb7   :  { %v118_v55 = vpop.permute.xlu0 %117 }
  0xb8   :  { %v288_v51 = vpop.permute.xlu1 %287  ;;  %v428_v3 = vsel %vm422_vm4, %v915_v25, %v118_v55 }
  0xb9   :  { %v458_v56 = vsel %vm456_vm6, %v441_v57, %v288_v51 }
  0xba   :  { %v136_v54 = vpop.permute.xlu2 %135 }
  0xbb   :  { %v437_v34 = vsel %vm422_vm4, %v1062_v43, %v136_v54 }
  0xbf   :  { %v207_v11 = vpop.permute.xlu0 %206 }
  0xc0   :  { %v377_v60 = vpop.permute.xlu1 %376  ;;  %v445_v2 = vsel %vm439_vm5, %v428_v3, %v207_v11 }
  0xc1   :  { %v475_v58 = vsel %vm473_vm7, %v458_v56, %v377_v60 }
  0xc2   :  { %751 = vmatmul.msk.f32.gmra.mxu0 %vm495_vm8, %v475_v58  ;;  %v225_v63 = vpop.permute.xlu2 %224 }
  0xc3   :  { %v454_v23 = vsel %vm439_vm5, %v437_v34, %v225_v63 }
  0xc7   :  { %v296_v59 = vpop.permute.xlu0 %295 }
  0xc8   :  { %v462_v14 = vsel %vm456_vm6, %v445_v2, %v296_v59  ;;  %v385_v5 = vpop.permute.xlu1 %384 }
  0xc9   :  { %v479_v49 = vsel %vm473_vm7, %v462_v14, %v385_v5 }
  0xca   :  { %755 = vmatmul.msk.f32.gmra.mxu1 %vm495_vm8, %v479_v49  ;;  %v290_v10 = vpop.permute.xlu2 %289 }
  0xcf   :  { %v217_v16 = vpop.permute.xlu0 %216 }
  0xd0   :  { %v112_v4 = vpop.permute.xlu1 %111  ;;  %v450_v22 = vsel %vm439_vm5, %v433_v20, %v217_v16 }
  0xd1   :  { %v425_v9 = vsel %vm422_vm4, %v1048_v40, %v112_v4 }
  0xd2   :  { %v379_v7 = vpop.permute.xlu2 %378 }
  0xd7   :  { %v306_v19 = vpop.permute.xlu0 %305 }
  0xd8   :  { %v201_v13 = vpop.permute.xlu1 %200  ;;  %v467_v24 = vsel %vm456_vm6, %v450_v22, %v306_v19 }
  0xd9   :  { %v442_v25 = vsel %vm439_vm5, %v425_v9, %v201_v13  ;;  %v610_v13 = vld [vmem:[%s1406_s3 + $0x8] sm:$0xff] }
  0xda   :  { %v459_v12 = vsel %vm456_vm6, %v442_v25, %v290_v10  ;;  %v387_v26 = vpop.permute.xlu2 %386  ;;  %v609_v25 = vld [vmem:[%s1406_s3] sm:$0xff] }
  0xdb   :  { %v476_v21 = vsel %vm473_vm7, %v459_v12, %v379_v7 }
  0xdc   :  { %752 = vmatmul.msk.f32.gmra.mxu0 %vm495_vm8, %v476_v21 }
  0xdf   :  { %v395_v31 = vpop.permute.xlu0 %394 }
  0xe0   :  { %v120_v40 = vpop.permute.xlu1 %119  ;;  %v484_v17 = vsel %vm473_vm7, %v467_v24, %v395_v31 }
  0xe1   :  { %760 = vmatmul.msk.f32.gmra.mxu2 %vm495_vm8, %v484_v17  ;;  %v429_v53 = vsel %vm422_vm4, %v1115_v6, %v120_v40 }
  0xe2   :  { %v114_v43 = vpop.permute.xlu2 %113 }
  0xe3   :  { %v426_v51 = vsel %vm422_vm4, %v1053_v41, %v114_v43 }
  0xe7   :  { %v314_v37 = vpop.permute.xlu0 %313 }
  0xe8   :  { %v209_v46 = vpop.permute.xlu1 %208  ;;  %v471_v28 = vsel %vm456_vm6, %v454_v23, %v314_v37 }
  0xe9   :  { %v446_v62 = vsel %vm439_vm5, %v429_v53, %v209_v46 }
  0xea   :  { %v203_v30 = vpop.permute.xlu2 %202 }
  0xeb   :  { %v443_v54 = vsel %vm439_vm5, %v426_v51, %v203_v30 }
  0xef   :  { %v403_v0 = vpop.permute.xlu0 %402 }
  0xf0   :  { %v298_v15 = vpop.permute.xlu1 %297  ;;  %v488_v18 = vsel %vm473_vm7, %v471_v28, %v403_v0 }
  0xf1   :  { %v463_v27 = vsel %vm456_vm6, %v446_v62, %v298_v15  ;;  %764 = vmatmul.msk.f32.gmra.mxu3 %vm495_vm8, %v488_v18 }
  0xf2   :  { %v480_v48 = vsel %vm473_vm7, %v463_v27, %v387_v26  ;;  %v122_v38 = vpop.permute.xlu2 %121 }
  0xf3   :  { %756 = vmatmul.msk.f32.gmra.mxu1 %vm495_vm8, %v480_v48  ;;  %v430_v63 = vsel %vm422_vm4, %v1120_v8, %v122_v38 }
  0xf7   :  { %v130_v6 = vpop.permute.xlu0 %129 }
  0xf8   :  { %v219_v1 = vpop.permute.xlu1 %218  ;;  %v434_v33 = vsel %vm422_vm4, %v1037_v35, %v130_v6 }
  0xf9   :  { %v451_v39 = vsel %vm439_vm5, %v434_v33, %v219_v1 }
  0xfa   :  { %v211_v55 = vpop.permute.xlu2 %210 }
  0xff   :  { %v138_v29 = vpop.permute.xlu0 %137 }
 0x100   :  { %v308_v32 = vpop.permute.xlu1 %307  ;;  %v438_v35 = vsel %vm422_vm4, %v1067_v44, %v138_v29  ;;  %v447_v44 = vsel %vm439_vm5, %v430_v63, %v211_v55 }
 0x101   :  { %v468_v36 = vsel %vm456_vm6, %v451_v39, %v308_v32 }
 0x102   :  { %v300_v3 = vpop.permute.xlu2 %299 }
 0x103   :  { %v464_v2 = vsel %vm456_vm6, %v447_v44, %v300_v3 }
 0x107   :  { %v227_v47 = vpop.permute.xlu0 %226 }
 0x108   :  { %v397_v42 = vpop.permute.xlu1 %396  ;;  %v455_v52 = vsel %vm439_vm5, %v438_v35, %v227_v47 }
 0x109   :  { %v485_v50 = vsel %vm473_vm7, %v468_v36, %v397_v42 }
 0x10a   :  { %761 = vmatmul.msk.f32.gmra.mxu2 %vm495_vm8, %v485_v50 }
 0x10d   :  { %v585_v5 = vpop.f32.mrf.mxu2 }
 0x10e   :  { %v619_v40 = vadd.f32 %v609_v25, %v585_v5 }
 0x10f   :  { %v292_v61 = vpop.permute.xlu0 %291 }
 0x110   :  { %v316_v45 = vpop.permute.xlu1 %315  ;;  %v460_v57 = vsel %vm456_vm6, %v443_v54, %v292_v61 }
 0x111   :  { %v472_v56 = vsel %vm456_vm6, %v455_v52, %v316_v45 }
 0x116   :  { %v561_v10 = vpop.f32.mrf.mxu0 }
 0x117   :  { %v381_v11 = vpop.permute.xlu0 %380  ;;  %v611_v24 = vadd.f32 %v609_v25, %v561_v10 }
 0x118   :  { %v405_v60 = vpop.permute.xlu1 %404  ;;  %v477_v58 = vsel %vm473_vm7, %v460_v57, %v381_v11 }
 0x119   :  { %753 = vmatmul.msk.f32.gmra.mxu0 %vm495_vm8, %v477_v58  ;;  %v489_v41 = vsel %vm473_vm7, %v472_v56, %v405_v60 }
 0x11a   :  { %765 = vmatmul.msk.f32.gmra.mxu3 %vm495_vm8, %v489_v41 }
 0x11d   :  { %v597_v16 = vpop.f32.mrf.mxu3 }
 0x11e   :  { %v573_v8 = vpop.f32.mrf.mxu1  ;;  %v623_v23 = vadd.f32 %v609_v25, %v597_v16 }
 0x11f   :  { %v389_v59 = vpop.permute.xlu0 %388  ;;  %v615_v21 = vadd.f32 %v609_v25, %v573_v8 }
 0x120   :  { %v481_v14 = vsel %vm473_vm7, %v464_v2, %v389_v59 }
 0x121   :  { %757 = vmatmul.msk.f32.gmra.mxu1 %vm495_vm8, %v481_v14 }
 0x128   :  { %v588_v49 = vpop.f32.mrf.mxu2 }
 0x129   :  { %v620_v22 = vadd.f32 %v610_v13, %v588_v49 }
 0x12b   :  { %v655_v28 = vmax.f32 %v619_v40, %v620_v22 }
 0x12d   :  { %v656_v27 = vrot.slane %v655_v28, 4 }
 0x12f   :  { %v657_v47 = vmax.f32 %v655_v28, %v656_v27 }
 0x131   :  { %v658_v55 = vrot.slane %v657_v47, 2 }
 0x133   :  { %v659_v3 = vmax.f32 %v657_v47, %v658_v55 }
 0x137   :  { %v600_v12 = vpop.f32.mrf.mxu3 }
 0x138   :  { %v624_v17 = vadd.f32 %v610_v13, %v600_v12  ;;  %v786_v12 = vld [vmem:[%s1405_s2] ss:$0 sm:$0xff]  ;;  %s817_s2 = smov [#allocation2]  }
 0x139   :  { %s739_s5 = sshll.u32 %s817_s2, 4  ;;  %s740_s5 = int_to_ptr.vmem [resolvable:$true] %s739_s5 }
 0x13a   :  { %v669_v62 = vmax.f32 %v623_v23, %v624_v17 }
 0x13c   :  { %v670_v6 = vrot.slane %v669_v62, 4 }
 0x13e   :  { %v671_v42 = vmax.f32 %v669_v62, %v670_v6 }
 0x13f   :  { %v564_v9 = vpop.f32.mrf.mxu0 }
 0x140   :  { %v612_v20 = vadd.f32 %v610_v13, %v564_v9  ;;  %v672_v52 = vrot.slane %v671_v42, 2 }
 0x142   :  { %v627_v34 = vmax.f32 %v611_v24, %v612_v20  ;;  %v673_v49 = vmax.f32 %v671_v42, %v672_v52 }
 0x144   :  { %v628_v18 = vrot.slane %v627_v34, 4 }
 0x146   :  { %v629_v32 = vmax.f32 %v627_v34, %v628_v18 }
 0x147   :  { %v576_v19 = vpop.f32.mrf.mxu1 }
 0x148   :  { %v616_v7 = vadd.f32 %v610_v13, %v576_v19  ;;  %v630_v61 = vrot.slane %v629_v32, 2  ;;  %v660_v19 = vrot.slane %v659_v3, 1 }
 0x14a   :  { %v641_v37 = vmax.f32 %v615_v21, %v616_v7  ;;  %v631_v58 = vmax.f32 %v629_v32, %v630_v61  ;;  %v674_v21 = vrot.slane %v673_v49, 1 }
 0x14c   :  { %v642_v15 = vrot.slane %v641_v37, 4  ;;  %v632_v16 = vrot.slane %v631_v58, 1  ;;  %v675_v23 = vmax.f32 %v673_v49, %v674_v21 }
 0x14e   :  { %v643_v1 = vmax.f32 %v641_v37, %v642_v15  ;;  %v661_v37 = vmax.f32 %v659_v3, %v660_v19 }
 0x150   :  { %v644_v50 = vrot.slane %v643_v1, 2  ;;  %v691_v18 = vadd.f32 %v786_v12, %v661_v37 }
 0x152   :  { %v645_v57 = vmax.f32 %v643_v1, %v644_v50  ;;  %v693_v1 = vadd.f32 %v786_v12, %v675_v23 }
 0x154   :  { %v646_v10 = vrot.slane %v645_v57, 1  ;;  %v701_v50 = vmax.f32 %v693_v1, 0.0 }
 0x156   :  { %v647_v22 = vmax.f32 %v645_v57, %v646_v10  ;;  %v726_v57 = vrot.slane %v701_v50, 2 }
 0x158   :  { %v689_v28 = vadd.f32 %v786_v12, %v647_v22 }
 0x159   :  { %v567_v46 = vpop.f32.mrf.mxu0 }
 0x15a   :  { %v613_v33 = vadd.f32 %v609_v25, %v567_v46 }
 0x164   :  { %v591_v4 = vpop.f32.mrf.mxu2 }
 0x165   :  { %v621_v53 = vadd.f32 %v609_v25, %v591_v4 }
 0x170   :  { %v579_v30 = vpop.f32.mrf.mxu1 }
 0x171   :  { %v617_v63 = vadd.f32 %v609_v25, %v579_v30  ;;  %v697_v30 = vmax.f32 %v689_v28, 0.0 }
 0x173   :  { %v714_v42 = vrot.slane %v697_v30, 6 }
 0x174   :  { %v603_v48 = vpop.f32.mrf.mxu3 }
 0x175   :  { %v625_v11 = vadd.f32 %v609_v25, %v603_v48 }
 0x18d   :  { %v594_v31 = vpop.f32.mrf.mxu2 }
 0x18e   :  { %v622_v26 = vadd.f32 %v610_v13, %v594_v31  ;;  %v633_v31 = vmax.f32 %v631_v58, %v632_v16 }
 0x190   :  { %v662_v0 = vmax.f32 %v621_v53, %v622_v26  ;;  %v687_v62 = vadd.f32 %v786_v12, %v633_v31 }
 0x192   :  { %v663_v43 = vrot.slane %v662_v0, 4 }
 0x194   :  { %v664_v36 = vmax.f32 %v662_v0, %v663_v43 }
 0x196   :  { %v570_v29 = vpop.f32.mrf.mxu0  ;;  %v665_v51 = vrot.slane %v664_v36, 2 }
 0x197   :  { %v614_v39 = vadd.f32 %v610_v13, %v570_v29  ;;  %v695_v29 = vmax.f32 %v687_v62, 0.0 }
 0x198   :  { %v666_v59 = vmax.f32 %v664_v36, %v665_v51 }
 0x199   :  { %v634_v38 = vmax.f32 %v613_v33, %v614_v39  ;;  %v699_v39 = vmax.f32 %v691_v18, 0.0 }
 0x19a   :  { %v667_v25 = vrot.slane %v666_v59, 1 }
 0x19b   :  { %v635_v45 = vrot.slane %v634_v38, 4  ;;  %v720_v55 = vrot.slane %v699_v39, 4 }
 0x19c   :  { %v668_v26 = vmax.f32 %v666_v59, %v667_v25 }
 0x19d   :  { %v636_v54 = vmax.f32 %v634_v38, %v635_v45  ;;  %v606_v35 = vpop.f32.mrf.mxu3 }
 0x19e   :  { %v626_v56 = vadd.f32 %v610_v13, %v606_v35  ;;  %v582_v60 = vpop.f32.mrf.mxu1  ;;  %v692_v48 = vadd.f32 %v786_v12, %v668_v26 }
 0x19f   :  { %v637_v41 = vrot.slane %v636_v54, 2  ;;  %v618_v44 = vadd.f32 %v610_v13, %v582_v60 }
 0x1a0   :  { %v676_v2 = vmax.f32 %v625_v11, %v626_v56  ;;  %v700_v47 = vmax.f32 %v692_v48, 0.0 }
 0x1a1   :  { %v638_v14 = vmax.f32 %v636_v54, %v637_v41  ;;  %v648_v5 = vmax.f32 %v617_v63, %v618_v44 }
 0x1a2   :  { %v677_v8 = vrot.slane %v676_v2, 4  ;;  %v723_v54 = vrot.slane %v700_v47, 3 }
 0x1a3   :  { %v639_v4 = vrot.slane %v638_v14, 1  ;;  %v649_v9 = vrot.slane %v648_v5, 4 }
 0x1a4   :  { %v678_v7 = vmax.f32 %v676_v2, %v677_v8 }
 0x1a5   :  { %v640_v20 = vmax.f32 %v638_v14, %v639_v4  ;;  %v650_v13 = vmax.f32 %v648_v5, %v649_v9 }
 0x1a6   :  { %v679_v24 = vrot.slane %v678_v7, 2 }
 0x1a7   :  { %v688_v40 = vadd.f32 %v786_v12, %v640_v20  ;;  %v651_v17 = vrot.slane %v650_v13, 2 }
 0x1a8   :  { %v680_v46 = vmax.f32 %v678_v7, %v679_v24 }
 0x1a9   :  { %v696_v34 = vmax.f32 %v688_v40, 0.0  ;;  %v652_v53 = vmax.f32 %v650_v13, %v651_v17 }
 0x1aa   :  { %v681_v0 = vrot.slane %v680_v46, 1 }
 0x1ab   :  { %v653_v15 = vrot.slane %v652_v53, 1  ;;  %v711_v43 = vrot.slane %v696_v34, 7 }
 0x1ac   :  { %v682_v27 = vmax.f32 %v680_v46, %v681_v0 }
 0x1ad   :  { %v654_v6 = vmax.f32 %v652_v53, %v653_v15  ;;  %v713_v36 = vsel %vm712_vm9, %v711_v43, %v695_v29 }
 0x1ae   :  { %v694_v33 = vadd.f32 %v786_v12, %v682_v27  ;;  %v716_v51 = vsel %vm715_vm10, %v714_v42, %v713_v36 }
 0x1af   :  { %v690_v32 = vadd.f32 %v786_v12, %v654_v6 }
 0x1b0   :  { %v702_v45 = vmax.f32 %v694_v33, 0.0 }
 0x1b1   :  { %v698_v38 = vmax.f32 %v690_v32, 0.0 }
 0x1b2   :  { %v729_v56 = vrot.slane %v702_v45, 1 }
 0x1b3   :  { %v717_v61 = vrot.slane %v698_v38, 5 }
 0x1b5   :  { %v719_v35 = vsel %vm718_vm11, %v717_v61, %v716_v51 }
 0x1b6   :  { %v722_v52 = vsel %vm721_vm12, %v720_v55, %v719_v35 }
 0x1b7   :  { %v725_v11 = vsel %vm724_vm13, %v723_v54, %v722_v52 }
 0x1b8   :  { %v728_v60 = vsel %vm727_vm14, %v726_v57, %v725_v11 }
 0x1b9   :  { %v731_v58 = vsel %vm730_vm15, %v729_v56, %v728_v60 }
 0x1ba   :  { %733 = vst [vmem:[#allocation2] sm:$0xff] %v731_v58 }
 0x1bb   :  { %744 = dma.vmem_to_hbm [thread:$0]  %s740_s5, 128, %s742_s9, [#allocation3]  }
 0x1bc   :  { %811 = dma.done.wait [#allocation3], 128  }
 0x1bd   :  { %812 = vsyncadd [#allocation3], 4294967168 }
 0x1be   :  { %749 = vsyncpa [#allocation3], 1 }

</bundles_post_ra>
